<compile_context>
chip_gen: v6e
topology: v6e:2x2x1
jax: 0.10.0
libtpu: 0.0.40
codegen_flags: <defaults>
</compile_context>

<pallas_src>
import numpy as np
import jax
import jax.numpy as jnp
from jax.experimental import pallas as pl
from jax.experimental.pallas import tpu as pltpu


def _round_up(a, b):
    return ((a + b - 1) // b) * b


def residual_block_kernel(x_ref, w1t_ref, b1_ref, w2t_ref, b2_ref, o_ref):
    # x_ref:   (TB, F) input tile
    # w1t_ref: (F, F)  first weight, already transposed to (in, out), matmul dtype
    # b1_ref:  (1, F)  first bias (f32)
    # w2t_ref: (F, F)  second weight, already transposed to (in, out), matmul dtype
    # b2_ref:  (1, F)  second bias (f32)
    x = x_ref[...]
    x_f32 = x.astype(jnp.float32)          # residual path stays in f32
    x_mm = x.astype(w1t_ref.dtype)         # matmul input dtype (bf16 by default)

    # h = ReLU(x @ W1t + b1)   -- MXU matmul, f32 accumulation
    h = jnp.dot(x_mm, w1t_ref[...], preferred_element_type=jnp.float32)
    h = jnp.maximum(h + b1_ref[...], 0.0)

    # y = h @ W2t + b2
    y = jnp.dot(h.astype(w2t_ref.dtype), w2t_ref[...],
                preferred_element_type=jnp.float32)
    y = y + b2_ref[...]

    # residual add
    o_ref[...] = (x_f32 + y).astype(o_ref.dtype)


def _choose_tile_b(n, tile_b, min_steps=4):
    """Batch tile: big (amortize ~0.35us/step), 8-aligned, but keep >= min_steps grid
    steps when the batch allows it so v7x's two TensorCores both get work."""
    tb = min(tile_b, _round_up(max(n, 1), 8))
    cap = _round_up(pl.cdiv(max(n, 1), min_steps), 8)
    tb = min(tb, max(8, cap))
    return max(8, (tb // 8) * 8)


def residual_block(x, w1, b1, w2, b2, *, tile_b=1024, matmul_dtype=jnp.bfloat16,
                   single_buffer_weights=True):
    """x: (N, F); w1, w2: (F, F) in PyTorch (out, in) layout; b1, b2: (F,).

    matmul_dtype: dtype the MXU sees for both operands (accumulation is always f32).
    Default bf16; pass jnp.float32 for exact f32 matmuls.
    """
    N, F = x.shape
    out_dtype = x.dtype
    mm_dtype = matmul_dtype if matmul_dtype is not None else x.dtype

    tb = _choose_tile_b(N, tile_b)
    grid = (pl.cdiv(N, tb),)   # partial last block handled by Pallas; no wrapper pad

    # Hoist the weight transpose (and matmul-dtype cast) out of the kernel.
    w1t = jnp.asarray(w1.T, dtype=mm_dtype)
    w2t = jnp.asarray(w2.T, dtype=mm_dtype)
    b1_2d = jnp.asarray(b1, dtype=jnp.float32).reshape(1, F)
    b2_2d = jnp.asarray(b2, dtype=jnp.float32).reshape(1, F)

    act_bytes = jnp.dtype(out_dtype).itemsize
    w_bytes = jnp.dtype(mm_dtype).itemsize
    cost = pl.CostEstimate(
        flops=4 * N * F * F,                     # two (N,F)x(F,F) matmuls
        transcendentals=0,
        bytes_accessed=2 * N * F * act_bytes + 2 * F * F * w_bytes + 2 * F * 4,
    )

    def _call(single_buf):
        # Grid-invariant operands: single-buffer them (constant index_map) when asked.
        wkw = dict(pipeline_mode=pl.Buffered(1)) if single_buf else {}
        grid_spec = pltpu.PrefetchScalarGridSpec(
            num_scalar_prefetch=0,
            grid=grid,
            in_specs=[
                pl.BlockSpec((tb, F), lambda i: (i, 0)),          # x tile
                pl.BlockSpec((F, F), lambda i: (0, 0), **wkw),    # W1.T (VMEM-resident)
                pl.BlockSpec((1, F), lambda i: (0, 0), **wkw),    # b1
                pl.BlockSpec((F, F), lambda i: (0, 0), **wkw),    # W2.T (VMEM-resident)
                pl.BlockSpec((1, F), lambda i: (0, 0), **wkw),    # b2
            ],
            out_specs=pl.BlockSpec((tb, F), lambda i: (i, 0)),
        )
        return pl.pallas_call(
            residual_block_kernel,
            out_shape=jax.ShapeDtypeStruct((N, F), out_dtype),
            grid_spec=grid_spec,
            compiler_params=pltpu.CompilerParams(
                dimension_semantics=("parallel",),
            ),
            cost_estimate=cost,
        )(x, w1t, b1_2d, w2t, b2_2d)

    if single_buffer_weights:
        try:
            out = _call(True)
            jax.block_until_ready(out)   # surface lowering/runtime issues here
            return out
        except Exception:
            # Fallback: some builds may reject Buffered(1); double-buffering the
            # tiny (F=128) weights costs ~130 KiB of VMEM, which is harmless.
            pass
    return _call(False)


def residual_block_ref_np(x, w1, b1, w2, b2):
    """float64 numpy reference (exact ground truth)."""
    x64 = np.asarray(x, np.float64)
    w1_ = np.asarray(w1, np.float64)
    b1_ = np.asarray(b1, np.float64)
    w2_ = np.asarray(w2, np.float64)
    b2_ = np.asarray(b2, np.float64)
    h = np.maximum(x64 @ w1_.T + b1_, 0.0)
    y = h @ w2_.T + b2_
    return x64 + y


def residual_block_ref_jnp(x, w1, b1, w2, b2, matmul_dtype):
    """JAX reference using the same matmul dtype / f32 accumulation as the kernel."""
    dt = matmul_dtype
    h = jnp.dot(x.astype(dt), w1.T.astype(dt), preferred_element_type=jnp.float32)
    h = jnp.maximum(h + b1.astype(jnp.float32)[None, :], 0.0)
    y = jnp.dot(h.astype(dt), w2.T.astype(dt), preferred_element_type=jnp.float32)
    y = y + b2.astype(jnp.float32)[None, :]
    return (x.astype(jnp.float32) + y).astype(x.dtype)


if __name__ == "__main__":
    key = jax.random.PRNGKey(0)
    kx, k1, kb1, k2, kb2, kx2 = jax.random.split(key, 6)

    # Shapes consistent with the module: in_features = F.
    F = 128
    bound = 1.0 / (F ** 0.5)
    w1 = jax.random.uniform(k1, (F, F), minval=-bound, maxval=bound, dtype=jnp.float32)
    b1 = jax.random.uniform(kb1, (F,), minval=-bound, maxval=bound, dtype=jnp.float32)
    w2 = jax.random.uniform(k2, (F, F), minval=-bound, maxval=bound, dtype=jnp.float32)
    b2 = jax.random.uniform(kb2, (F,), minval=-bound, maxval=bound, dtype=jnp.float32)

    # Main check: batch large enough for big tiles and >= 4 grid iterations.
    N = 512
    x = jax.random.normal(kx, (N, F), dtype=jnp.float32)
    ref64 = residual_block_ref_np(x, w1, b1, w2, b2)

    # 1) Default path: bf16 MXU inputs, f32 accumulation.
    out_bf16 = jax.block_until_ready(residual_block(x, w1, b1, w2, b2))
    assert out_bf16.shape == (N, F)
    # Tight check vs same-precision XLA reference, loose sanity check vs f64 ref.
    ref_bf16 = residual_block_ref_jnp(x, w1, b1, w2, b2, jnp.bfloat16)
    assert jnp.allclose(out_bf16, ref_bf16, atol=5e-3, rtol=5e-3), \
        "bf16 path mismatch vs bf16 reference"
    assert np.allclose(np.asarray(out_bf16), ref64, atol=1e-1, rtol=1e-1), \
        "bf16 path mismatch vs f64 reference"

    # 2) Full-f32 matmul path.
    out_f32 = jax.block_until_ready(
        residual_block(x, w1, b1, w2, b2, matmul_dtype=jnp.float32))
    assert np.allclose(np.asarray(out_f32), ref64, atol=2e-2, rtol=2e-2), \
        "f32 path mismatch vs f64 reference"

    # 3) Ragged batch: exercises the partial-last-block path (no wrapper pad/copy).
    N2 = 13
    x2 = jax.random.normal(kx2, (N2, F), dtype=jnp.float32)
    out2 = jax.block_until_ready(residual_block(x2, w1, b1, w2, b2))
    ref2_64 = residual_block_ref_np(x2, w1, b1, w2, b2)
    assert out2.shape == (N2, F)
    assert np.allclose(np.asarray(out2), ref2_64, atol=1e-1, rtol=1e-1), \
        "ragged-batch mismatch vs f64 reference"

    print("KERNEL_OK")
</pallas_src>

<mosaic_0001>
module attributes {stable_mosaic.version = 11 : i64} {
  func.func @residual_block_kernel(%arg0: i32, %arg1: memref<128x128xf32, #tpu.memory_space<vmem>>, %arg2: memref<128x128xbf16, #tpu.memory_space<vmem>>, %arg3: memref<1x128xf32, #tpu.memory_space<vmem>>, %arg4: memref<128x128xbf16, #tpu.memory_space<vmem>>, %arg5: memref<1x128xf32, #tpu.memory_space<vmem>>, %arg6: memref<128x128xf32, #tpu.memory_space<vmem>>) attributes {dimension_semantics = [#tpu.dimension_semantics<parallel>], iteration_bounds = array<i64: 4>, scalar_prefetch = 0 : i64, scratch_operands = 0 : i64, tpu.core_type = #tpu.core_type<tc>, window_params = [{transform_indices = @transform_0, window_bounds = array<i64: 128, 128>}, {pipeline_mode = #tpu.pipeline_mode<synchronous>, transform_indices = @transform_1, window_bounds = array<i64: 128, 128>}, {pipeline_mode = #tpu.pipeline_mode<synchronous>, transform_indices = @transform_2, window_bounds = array<i64: 1, 128>}, {pipeline_mode = #tpu.pipeline_mode<synchronous>, transform_indices = @transform_3, window_bounds = array<i64: 128, 128>}, {pipeline_mode = #tpu.pipeline_mode<synchronous>, transform_indices = @transform_4, window_bounds = array<i64: 1, 128>}, {transform_indices = @transform_5, window_bounds = array<i64: 128, 128>}]} {
    %c0 = arith.constant 0 : index
    %c0_0 = arith.constant 0 : index
    %0 = vector.load %arg1[%c0, %c0_0] : memref<128x128xf32, #tpu.memory_space<vmem>>, vector<128x128xf32>
    %1 = arith.truncf %0 : vector<128x128xf32> to vector<128x128xbf16>
    %c0_1 = arith.constant 0 : index
    %c0_2 = arith.constant 0 : index
    %2 = vector.load %arg2[%c0_1, %c0_2] : memref<128x128xbf16, #tpu.memory_space<vmem>>, vector<128x128xbf16>
    %cst = arith.constant dense<0.000000e+00> : vector<128x128xf32>
    %3 = tpu.matmul %1, %2, %cst {dimension_numbers = #tpu.dot_dimension_numbers<[1], [0], [0], [1], [0, 0, 1, 1], [], []>} : vector<128x128xbf16>, vector<128x128xbf16>, vector<128x128xf32> -> vector<128x128xf32>
    %c0_3 = arith.constant 0 : index
    %c0_4 = arith.constant 0 : index
    %4 = vector.load %arg3[%c0_3, %c0_4] : memref<1x128xf32, #tpu.memory_space<vmem>>, vector<1x128xf32>
    %5 = vector.broadcast %4 : vector<1x128xf32> to vector<128x128xf32>
    %6 = arith.addf %3, %5 : vector<128x128xf32>
    %cst_5 = arith.constant 0.000000e+00 : f32
    %7 = vector.broadcast %cst_5 : f32 to vector<128x128xf32>
    %8 = arith.maximumf %6, %7 : vector<128x128xf32>
    %9 = arith.truncf %8 : vector<128x128xf32> to vector<128x128xbf16>
    %c0_6 = arith.constant 0 : index
    %c0_7 = arith.constant 0 : index
    %10 = vector.load %arg4[%c0_6, %c0_7] : memref<128x128xbf16, #tpu.memory_space<vmem>>, vector<128x128xbf16>
    %cst_8 = arith.constant dense<0.000000e+00> : vector<128x128xf32>
    %11 = tpu.matmul %9, %10, %cst_8 {dimension_numbers = #tpu.dot_dimension_numbers<[1], [0], [0], [1], [0, 0, 1, 1], [], []>} : vector<128x128xbf16>, vector<128x128xbf16>, vector<128x128xf32> -> vector<128x128xf32>
    %c0_9 = arith.constant 0 : index
    %c0_10 = arith.constant 0 : index
    %12 = vector.load %arg5[%c0_9, %c0_10] : memref<1x128xf32, #tpu.memory_space<vmem>>, vector<1x128xf32>
    %13 = vector.broadcast %12 : vector<1x128xf32> to vector<128x128xf32>
    %14 = arith.addf %11, %13 : vector<128x128xf32>
    %15 = arith.addf %0, %14 : vector<128x128xf32>
    %c0_11 = arith.constant 0 : index
    %c0_12 = arith.constant 0 : index
    %16 = vector.load %arg6[%c0_11, %c0_12] : memref<128x128xf32, #tpu.memory_space<vmem>>, vector<128x128xf32>
    tpu.vector_store %arg6[%c0_11, %c0_12], %15 {strides = array<i32>} : memref<128x128xf32, #tpu.memory_space<vmem>>, vector<128x128xf32>,
    return
  }
  func.func @transform_0(%arg0: i32) -> (i32, i32) {
    %c0_i32 = arith.constant 0 : i32
    %c0_i32_0 = arith.constant 0 : i32
    return %arg0, %c0_i32 : i32, i32
  }
  func.func @transform_1(%arg0: i32) -> (i32, i32) {
    %c0_i32 = arith.constant 0 : i32
    %c0_i32_0 = arith.constant 0 : i32
    %c0_i32_1 = arith.constant 0 : i32
    return %c0_i32, %c0_i32_0 : i32, i32
  }
  func.func @transform_2(%arg0: i32) -> (i32, i32) {
    %c0_i32 = arith.constant 0 : i32
    %c0_i32_0 = arith.constant 0 : i32
    %c0_i32_1 = arith.constant 0 : i32
    return %c0_i32, %c0_i32_0 : i32, i32
  }
  func.func @transform_3(%arg0: i32) -> (i32, i32) {
    %c0_i32 = arith.constant 0 : i32
    %c0_i32_0 = arith.constant 0 : i32
    %c0_i32_1 = arith.constant 0 : i32
    return %c0_i32, %c0_i32_0 : i32, i32
  }
  func.func @transform_4(%arg0: i32) -> (i32, i32) {
    %c0_i32 = arith.constant 0 : i32
    %c0_i32_0 = arith.constant 0 : i32
    %c0_i32_1 = arith.constant 0 : i32
    return %c0_i32, %c0_i32_0 : i32, i32
  }
  func.func @transform_5(%arg0: i32) -> (i32, i32) {
    %c0_i32 = arith.constant 0 : i32
    %c0_i32_0 = arith.constant 0 : i32
    return %arg0, %c0_i32 : i32, i32
  }
}

module attributes {stable_mosaic.version = 11 : i64} {
  func.func @residual_block_kernel(%arg0: i32, %arg1: memref<128x128xf32, #tpu.memory_space<vmem>>, %arg2: memref<128x128xbf16, #tpu.memory_space<vmem>>, %arg3: memref<1x128xf32, #tpu.memory_space<vmem>>, %arg4: memref<128x128xbf16, #tpu.memory_space<vmem>>, %arg5: memref<1x128xf32, #tpu.memory_space<vmem>>, %arg6: memref<128x128xf32, #tpu.memory_space<vmem>>) attributes {dimension_semantics = [#tpu.dimension_semantics<parallel>], iteration_bounds = array<i64: 4>, scalar_prefetch = 0 : i64, scratch_operands = 0 : i64, tpu.core_type = #tpu.core_type<tc>, window_params = [{transform_indices = @transform_0, window_bounds = array<i64: 128, 128>}, {pipeline_mode = #tpu.pipeline_mode<synchronous>, transform_indices = @transform_1, window_bounds = array<i64: 128, 128>}, {pipeline_mode = #tpu.pipeline_mode<synchronous>, transform_indices = @transform_2, window_bounds = array<i64: 1, 128>}, {pipeline_mode = #tpu.pipeline_mode<synchronous>, transform_indices = @transform_3, window_bounds = array<i64: 128, 128>}, {pipeline_mode = #tpu.pipeline_mode<synchronous>, transform_indices = @transform_4, window_bounds = array<i64: 1, 128>}, {transform_indices = @transform_5, window_bounds = array<i64: 128, 128>}]} {
    %c0 = arith.constant 0 : index
    %c0_0 = arith.constant 0 : index
    %0 = vector.load %arg1[%c0, %c0_0] : memref<128x128xf32, #tpu.memory_space<vmem>>, vector<128x128xf32>
    %1 = arith.truncf %0 : vector<128x128xf32> to vector<128x128xbf16>
    %c0_1 = arith.constant 0 : index
    %c0_2 = arith.constant 0 : index
    %2 = vector.load %arg2[%c0_1, %c0_2] : memref<128x128xbf16, #tpu.memory_space<vmem>>, vector<128x128xbf16>
    %cst = arith.constant dense<0.000000e+00> : vector<128x128xf32>
    %3 = tpu.matmul %1, %2, %cst {dimension_numbers = #tpu.dot_dimension_numbers<[1], [0], [0], [1], [0, 0, 1, 1], [], []>} : vector<128x128xbf16>, vector<128x128xbf16>, vector<128x128xf32> -> vector<128x128xf32>
    %c0_3 = arith.constant 0 : index
    %c0_4 = arith.constant 0 : index
    %4 = vector.load %arg3[%c0_3, %c0_4] : memref<1x128xf32, #tpu.memory_space<vmem>>, vector<1x128xf32>
    %5 = vector.broadcast %4 : vector<1x128xf32> to vector<128x128xf32>
    %6 = arith.addf %3, %5 : vector<128x128xf32>
    %cst_5 = arith.constant 0.000000e+00 : f32
    %7 = vector.broadcast %cst_5 : f32 to vector<128x128xf32>
    %8 = arith.maximumf %6, %7 : vector<128x128xf32>
    %9 = arith.truncf %8 : vector<128x128xf32> to vector<128x128xbf16>
    %c0_6 = arith.constant 0 : index
    %c0_7 = arith.constant 0 : index
    %10 = vector.load %arg4[%c0_6, %c0_7] : memref<128x128xbf16, #tpu.memory_space<vmem>>, vector<128x128xbf16>
    %cst_8 = arith.constant dense<0.000000e+00> : vector<128x128xf32>
    %11 = tpu.matmul %9, %10, %cst_8 {dimension_numbers = #tpu.dot_dimension_numbers<[1], [0], [0], [1], [0, 0, 1, 1], [], []>} : vector<128x128xbf16>, vector<128x128xbf16>, vector<128x128xf32> -> vector<128x128xf32>
    %c0_9 = arith.constant 0 : index
    %c0_10 = arith.constant 0 : index
    %12 = vector.load %arg5[%c0_9, %c0_10] : memref<1x128xf32, #tpu.memory_space<vmem>>, vector<1x128xf32>
    %13 = vector.broadcast %12 : vector<1x128xf32> to vector<128x128xf32>
    %14 = arith.addf %11, %13 : vector<128x128xf32>
    %15 = arith.addf %0, %14 : vector<128x128xf32>
    %c0_11 = arith.constant 0 : index
    %c0_12 = arith.constant 0 : index
    %16 = vector.load %arg6[%c0_11, %c0_12] : memref<128x128xf32, #tpu.memory_space<vmem>>, vector<128x128xf32>
    tpu.vector_store %arg6[%c0_11, %c0_12], %15 {strides = array<i32>} : memref<128x128xf32, #tpu.memory_space<vmem>>, vector<128x128xf32>,
    return
  }
  func.func @transform_0(%arg0: i32) -> (i32, i32) {
    %c0_i32 = arith.constant 0 : i32
    %c0_i32_0 = arith.constant 0 : i32
    return %arg0, %c0_i32 : i32, i32
  }
  func.func @transform_1(%arg0: i32) -> (i32, i32) {
    %c0_i32 = arith.constant 0 : i32
    %c0_i32_0 = arith.constant 0 : i32
    %c0_i32_1 = arith.constant 0 : i32
    return %c0_i32, %c0_i32_0 : i32, i32
  }
  func.func @transform_2(%arg0: i32) -> (i32, i32) {
    %c0_i32 = arith.constant 0 : i32
    %c0_i32_0 = arith.constant 0 : i32
    %c0_i32_1 = arith.constant 0 : i32
    return %c0_i32, %c0_i32_0 : i32, i32
  }
  func.func @transform_3(%arg0: i32) -> (i32, i32) {
    %c0_i32 = arith.constant 0 : i32
    %c0_i32_0 = arith.constant 0 : i32
    %c0_i32_1 = arith.constant 0 : i32
    return %c0_i32, %c0_i32_0 : i32, i32
  }
  func.func @transform_4(%arg0: i32) -> (i32, i32) {
    %c0_i32 = arith.constant 0 : i32
    %c0_i32_0 = arith.constant 0 : i32
    %c0_i32_1 = arith.constant 0 : i32
    return %c0_i32, %c0_i32_0 : i32, i32
  }
  func.func @transform_5(%arg0: i32) -> (i32, i32) {
    %c0_i32 = arith.constant 0 : i32
    %c0_i32_0 = arith.constant 0 : i32
    return %arg0, %c0_i32 : i32, i32
  }
}

</mosaic_0001>

<bundles_post_ra>
// kernel: tpu_custom_call.1
= control target key start
LH: loop header
LB: loop body
LE: loop exit
PB: predicated region body
PF: predicated region fallthrough
CT: control target
= control target key end

     0   :  { %10 = vsyncpa [#allocation3], 0  ;;  %s1525_s0 = inlined_call_operand.hbm [shape: f32[512,128], index: 0, kind: input, shape index: {}]   ;;  %s1526_s1 = inlined_call_operand.hbm [shape: bf16[128,128], index: 1, kind: input, shape index: {}]   ;;  %s1527_s2 = inlined_call_operand.vmem [shape: f32[1,128], index: 2, kind: input, shape index: {}]   ;;  %s1528_s3 = inlined_call_operand.hbm [shape: bf16[128,128], index: 3, kind: input, shape index: {}]   ;;  %s1529_s4 = inlined_call_operand.vmem [shape: f32[1,128], index: 4, kind: input, shape index: {}]   ;;  %s1530_s5 = inlined_call_operand.hbm [shape: f32[512,128], index: 5, kind: output, shape index: {}]  }
   0x1   :  { %12 = vsyncpa [#allocation3 + $0x1], 0 }
   0x2   :  { %13 = vsyncpa [#allocation6], 0 }
   0x3   :  { %14 = vsyncpa [#allocation4], 0 }
   0x4   :  { %16 = vsyncpa [#allocation4 + $0x1], 0  ;;  %s1210_s18 = smov 0   ;;  %s1212_s19 = smov 0  }
   0x5   :  { %s1214_s20 = smov 0   ;;  %s1216_s21 = smov 0  }
   0x6 LB: > { %s1231_s22 = sadd.s32 4294967295, %s1168_s21   ;;  %s797_s23 = sadd.s32 4294967294, %s1168_s21   ;;  %s1168_s21 = sphi %s1216_s21, %s1551_s21   ;;  %s1164_s20 = sphi %s1214_s20, %s1550_s20   ;;  %s1160_s19 = sphi %s1212_s19, %s1549_s19   ;;  %s1156_s18 = sphi %s1210_s18, %s1548_s18  }
   0x7   : > { %p42_p0 = scmp.ne.s32.totalorder %s1160_s19, %s1156_s18  ;;  %p1531_p1 = scmp.eq.s32.totalorder %s1231_s22, 0 }
   0x8   : > { %p156_p3 = scmp.eq.s32.totalorder %s797_s23, 3  ;;  %p798_p5 = scmp.ge.s32.totalorder %s1168_s21, 1 }
   0x9   : > { %p1240_p4 = por %p1531_p1, %p42_p0  ;;  %p163_p7 = scmp.lt.s32.totalorder %s1168_s21, 5 }
   0xa   : > { %p1245_p6 = por %p156_p3, %p42_p0  ;;  %s1170_s27 = smov [#allocation5]  }
   0xb   : > { %s1535_s24 = scalar_select %p1240_p4, 1, 0 }
   0xc   : > { %s1536_s25 = scalar_select %p1245_p6, 1, 0 }
   0xd   : > { %p1250_p8 = pnand %p798_p5, %p163_p7  ;;  %s175_s28 = sshll.u32 %s1170_s27, 4  ;;  %s176_s28 = int_to_ptr.vmem [resolvable:$true] %s175_s28 }
   0xe   : > { %s1171_s30 = smov [#allocation7]   ;;  %s1031_s7 = scalar_lea.vmem %s176_s28, 1024 }
   0xf   : > { %s1537_s26 = scalar_select %p1250_p8, 1, 0 }
  0x10   : > { %p943_p9 = pneg %p1250_p8  ;;  %s191_s6 = sshll.u32 %s1171_s30, 4  ;;  %s192_s6 = int_to_ptr.vmem [resolvable:$true] %s191_s6 }
  0x11   : > { %p1032_p12 = scmp.ne.s32.totalorder %s176_s28, %s1031_s7  ;;  %p1039_p3 = scmp.lt.s32.totalorder %s176_s28, %s176_s28 }
  0x12   : > { %p1258_p10 = pnand %p943_p9, %p1531_p1  ;;  %p1040_p5 = scmp.lt.s32.totalorder %s1031_s7, %s1031_s7 }
  0x14   : > { %p1022_p11 = pneg %p1258_p10  ;;  %p1041_p7 = por %p1040_p5, %p1039_p3 }
  0x16   : > { %p1034_p13 = pnand %p1032_p12, %p1022_p11 }
  0x18   : > { %p1035_p0 = pneg %p1034_p13 }
  0x1a   : > { %p1042_p9 = pnand %p1041_p7, %p1035_p0 }
  0x1c   : > { %1045 = shalt.err (!%p1042_p9)
}
  0x1d   : > { %s1172_s8 = smov 64   ;;  %s1173_s9 = smov 4  }
  0x1e   : > { %946 = dma.hbm_to_vmem [thread:$0]  (!%p1258_p10), %s1526_s1, 1024, %s176_s28, [#allocation6], %s1172_s8, %s1172_s8, %s1173_s9  }
  0x1f   : > { %s1057_s12 = scalar_lea.vmem %s192_s6, 1024  ;;  %p1065_p2 = scmp.lt.s32.totalorder %s192_s6, %s192_s6 }
  0x20   : > { %p1058_p1 = scmp.ne.s32.totalorder %s192_s6, %s1057_s12  ;;  %p1066_p6 = scmp.lt.s32.totalorder %s1057_s12, %s1057_s12 }
  0x22   : > { %p1060_p12 = pnand %p1058_p1, %p1022_p11  ;;  %p1067_p3 = por %p1066_p6, %p1065_p2 }
  0x24   : > { %p1061_p13 = pneg %p1060_p12 }
  0x26   : > { %p1068_p0 = pnand %p1067_p3, %p1061_p13 }
  0x28   : > { %1071 = shalt.err (!%p1068_p0)
}
  0x29   : > { %949 = dma.hbm_to_vmem [thread:$0]  (!%p1258_p10), %s1528_s3, 1024, %s192_s6, [#allocation6], %s1172_s8, %s1172_s8, %s1173_s9  }
  0x2a   : > { %s1281_s15 = sadd.s32 1, %s1168_s21   ;;  %s29_s16 = sadd.s32 1, %s1164_s20 }
  0x2b   : > { %s26_s17 = ssub.s32 %s1168_s21, %s1281_s15  ;;  %p36_p1 = scmp.ne.s32.totalorder %s1164_s20, %s1160_s19 }
  0x2c   : > { %p27_p2 = scmp.eq.s32.totalorder %s26_s17, 0  ;;  %p37_p6 = scmp.eq.s32.totalorder %s1168_s21, 0 }
  0x2d   : > { %p1539_p11 = scmp.eq.s32.totalorder %s1231_s22, 3  ;;  %p960_p7 = scmp.lt.s32.totalorder %s1168_s21, 4 }
  0x2e   : > { %s1297_s27 = scalar_select %p27_p2, %s1164_s20, %s29_s16  }
  0x2f   : > { %p1291_p5 = por %p1539_p11, %p36_p1  ;;  %p38_p9 = por %p37_p6, %p36_p1 }
  0x30   : > { %s208_s28 = sand.u32 1, %s1164_s20   ;;  %s833_s30 = sshll.u32 %s1168_s21, 11 }
  0x31   : > { %s1540_s23 = scalar_select %p1291_p5, 1, 0 }
  0x32   : > { %s802_s29 = sshll.u32 %s208_s28, 7  ;;  %s1304_s8 = scalar_lea.hbm %s1525_s0, %s833_s30 }
  0x33   : > { %s212_s9 = scalar_lea.vmem [#allocation2], %s802_s29  ;;  %p1308_p10 = pnand %p960_p7, %p38_p9 }
  0x34   : > { %s219_s10 = sshll.u32 %s212_s9, 4  ;;  %s1312_s12 = scalar_lea.sflag [#allocation3], %s208_s28  ;;  %s1306_s10 = int_to_ptr.vmem [resolvable:$true] %s219_s10 }
  0x35   : > { %s1072_s13 = scalar_lea.hbm %s1304_s8, 2048  ;;  %p1074_p13 = pneg %p1308_p10 }
  0x36   : > { %p1073_p12 = scmp.ne.s32.totalorder %s1304_s8, %s1072_s13  ;;  %s1077_s17 = scalar_lea.hbm %s1525_s0, 8192 }
  0x37   : > { %p1078_p1 = scmp.lt.s32.totalorder %s1304_s8, %s1525_s0  ;;  %p1079_p2 = scmp.lt.s32.totalorder %s1077_s17, %s1072_s13 }
  0x38   : > { %p1075_p3 = pnand %p1074_p13, %p1073_p12 }
  0x39   : > { %p1080_p6 = por %p1079_p2, %p1078_p1 }
  0x3a   : > { %p1076_p0 = pneg %p1075_p3 }
  0x3c   : > { %p1081_p11 = pnand %p1080_p6, %p1076_p0 }
  0x3e   : > { %1084 = shalt.err (!%p1081_p11)
}
  0x3f   : > { %s1085_s28 = scalar_lea.vmem %s1306_s10, 2048  ;;  %s1174_s6 = smov [#allocation2]  }
  0x40   : > { %p1086_p7 = scmp.ne.s32.totalorder %s1306_s10, %s1085_s28  ;;  %s1090_s7 = sshll.u32 %s1174_s6, 4  ;;  %s1091_s7 = int_to_ptr.vmem [resolvable:$false] %s1090_s7 }
  0x41   : > { %s1092_s9 = scalar_lea.vmem %s1091_s7, 4096  ;;  %p1093_p3 = scmp.lt.s32.totalorder %s1306_s10, %s1091_s7 }
  0x42   : > { %p1088_p9 = pnand %p1086_p7, %p1074_p13  ;;  %p1094_p5 = scmp.lt.s32.totalorder %s1092_s9, %s1085_s28 }
  0x44   : > { %p1089_p12 = pneg %p1088_p9  ;;  %p1095_p4 = por %p1094_p5, %p1093_p3 }
  0x46   : > { %p1096_p8 = pnand %p1095_p4, %p1089_p12 }
  0x48   : > { %1099 = shalt.err (!%p1096_p8)
}
  0x49   : > { %s1175_s13 = smov 128   ;;  %s1176_s14 = smov 8  }
  0x4a   : > { %953 = dma.hbm_to_vmem [thread:$0]  (!%p1308_p10), %s1304_s8, 2048, %s1306_s10, %s1312_s12, %s1175_s13, %s1175_s13, %s1176_s14  }
  0x4b   : > { %p1542_p13 = scmp.ne.s32.totalorder %s1537_s26, 0 }
  0x4c   : > { %s1336_s16 = sand.u32 (!%p1542_p13), 1, %s1160_s19   ;;  %p1543_p4 = scmp.ne.s32.totalorder (!%p1542_p13), %s1535_s24, 0 }
  0x4d   : > { %231 = sbr.rel (%p1542_p13) target bundleno = 566 (0x236), region = 40  ;;  %s806_s17 = sshll.u32 (!%p1542_p13), %s1336_s16, 7 }
  0x4e   : > { %s234_s29 = scalar_lea.sflag (!%p1542_p13), [#allocation3], %s1336_s16  ;;  %s1342_s30 = scalar_lea.vmem (!%p1542_p13), [#allocation2], %s806_s17 }
  0x52   : > { %1143 = dma.done.wait (%p1543_p4), %s234_s29, 2048  }
  0x53   : > { %1145 = vsyncadd (%p1543_p4), %s234_s29, 4294965248  ;;  %p1544_p8 = scmp.eq.s32.totalorder %s1231_s22, 0 }
  0x55   : > { %1147 = dma.done.wait (%p1544_p8), [#allocation6], 2048   ;;  %p1545_p5 = pmov %p1544_p8 }
  0x56   : > { %v1004_v0 = vld [vmem:[#allocation5 + $0x38] sm:$0xff]   ;;  %v1005_v1 = vld [vmem:[#allocation5 + $0x30] sm:$0xff]   ;;  %v1006_v2 = vld [vmem:[#allocation5 + $0x28] sm:$0xff]   ;;  %s1429_s11 = scalar_lea.vmem [#allocation8], %s806_s17  ;;  %s834_s12 = sshll.u32 %s1231_s22, 11 }
  0x57   : > { %1149 = vsyncadd (%p1545_p5), [#allocation6], 4294965248  ;;  %867 = vmatprep.subr.bf16.mxu0 %v1004_v0  ;;  %v1007_v3 = vld [vmem:[#allocation5 + $0x20] sm:$0xff]   ;;  %v1356_v5 = vld [vmem:[%s1342_s30 + $0x8] sm:$0xff]  ;;  %s705_s28 = sshll.u32 %s1429_s11, 4  ;;  %s1478_s9 = scalar_lea.hbm %s1530_s5, %s834_s12  ;;  %s1480_s28 = int_to_ptr.vmem [resolvable:$true] %s705_s28 }
  0x58   : > { %868 = vmatpush3.bf16.msra.mxu0 %v1004_v0  ;;  %v1353_v4 = vld [vmem:[%s1342_s30] sm:$0xff]  ;;  %v1008_v7 = vld [vmem:[#allocation5 + $0x18] sm:$0xff]   ;;  %v1013_v9 = vld [vmem:[#allocation7 + $0x30] sm:$0xff]   ;;  %s692_s22 = scalar_lea.sflag [#allocation4], %s1336_s16  ;;  %s1100_s13 = scalar_lea.vmem %s1480_s28, 2048 }
  0x59   : > { %869 = vmatprep.subr.bf16.mxu0 %v1005_v1  ;;  %v291_v6 = vpack.c.bf16 %v1356_v5, %v1353_v4  ;;  %v1012_v8 = vld [vmem:[#allocation7 + $0x38] sm:$0xff]   ;;  %v1009_v10 = vld [vmem:[#allocation5 + $0x10] sm:$0xff]   ;;  %v1014_v11 = vld [vmem:[#allocation7 + $0x28] sm:$0xff]   ;;  %p1101_p10 = scmp.ne.s32.totalorder %s1480_s28, %s1100_s13  ;;  %p1546_p0 = scmp.ne.s32.totalorder %s1540_s23, 0 }
  0x5a   : > { %899 = vmatprep.subr.bf16.mxu1 %v1012_v8  ;;  %v1010_v12 = vld [vmem:[#allocation5 + $0x8] sm:$0xff]   ;;  %v1015_v13 = vld [vmem:[#allocation7 + $0x20] sm:$0xff]   ;;  %v1016_v15 = vld [vmem:[#allocation7 + $0x18] sm:$0xff]   ;;  %s1177_s14 = smov [#allocation8]  }
  0x5b   : > { %883 = vmatprep.mubr.bf16.mxu0 %v291_v6  ;;  %900 = vmatpush3.bf16.msra.mxu1 %v1012_v8  ;;  %v1011_v14 = vld [vmem:[#allocation5] sm:$0xff]   ;;  %v1361_v16 = vld [vmem:[%s1342_s30 + $0x10] sm:$0xff]  ;;  %v1364_v17 = vld [vmem:[%s1342_s30 + $0x18] sm:$0xff]  ;;  %p1102_p1 = pnand %p1101_p10, %p1546_p0  ;;  %s1104_s17 = sshll.u32 %s1177_s14, 4  ;;  %s1105_s17 = int_to_ptr.vmem [resolvable:$false] %s1104_s17 }
  0x5c   : > { %870 = vmatpush3.bf16.msra.mxu0 %v1005_v1  ;;  %901 = vmatprep.subr.bf16.mxu1 %v1013_v9  ;;  %v1367_v18 = vld [vmem:[%s1342_s30 + $0x20] sm:$0xff]  ;;  %v1370_v19 = vld [vmem:[%s1342_s30 + $0x28] sm:$0xff]  ;;  %v292_v20 = vpack.c.bf16 %v1364_v17, %v1361_v16  ;;  %v1377_v22 = vld [vmem:[%s1342_s30 + $0x30] sm:$0xff]  ;;  %s1106_s29 = scalar_lea.vmem %s1105_s17, 4096  ;;  %p1107_p6 = scmp.lt.s32.totalorder %s1480_s28, %s1105_s17 }
  0x5d   : > { %871 = vmatprep.subr.bf16.mxu0 %v1006_v2  ;;  %v293_v21 = vpack.c.bf16 %v1370_v19, %v1367_v18  ;;  %v1380_v23 = vld [vmem:[%s1342_s30 + $0x38] sm:$0xff]  ;;  %v1383_v24 = vld [vmem:[%s1342_s30 + $0x40] sm:$0xff]  ;;  %v1386_v25 = vld [vmem:[%s1342_s30 + $0x48] sm:$0xff]  ;;  %p1103_p2 = pneg %p1102_p1  ;;  %p1108_p11 = scmp.lt.s32.totalorder %s1106_s29, %s1100_s13 }
  0x5e   : > { %v294_v26 = vpack.c.bf16 %v1380_v23, %v1377_v22  ;;  %v295_v27 = vpack.c.bf16 %v1386_v25, %v1383_v24  ;;  %v1393_v28 = vld [vmem:[%s1342_s30 + $0x50] sm:$0xff]  ;;  %v1396_v29 = vld [vmem:[%s1342_s30 + $0x58] sm:$0xff]  ;;  %v1399_v30 = vld [vmem:[%s1342_s30 + $0x60] sm:$0xff] }
  0x5f   : > { %902 = vmatpush3.bf16.msra.mxu1 %v1013_v9  ;;  %v1402_v31 = vld [vmem:[%s1342_s30 + $0x68] sm:$0xff]  ;;  %v296_v32 = vpack.c.bf16 %v1396_v29, %v1393_v28  ;;  %v1409_v34 = vld [vmem:[%s1342_s30 + $0x70] sm:$0xff]  ;;  %v1412_v35 = vld [vmem:[%s1342_s30 + $0x78] sm:$0xff]  ;;  %p1109_p7 = por %p1108_p11, %p1107_p6 }
  0x60   : > { %872 = vmatpush3.bf16.msra.mxu0 %v1006_v2  ;;  %903 = vmatprep.subr.bf16.mxu1 %v1014_v11  ;;  %v297_v33 = vpack.c.bf16 %v1402_v31, %v1399_v30  ;;  %v298_v36 = vpack.c.bf16 %v1412_v35, %v1409_v34  ;;  %v1017_v37 = vld [vmem:[#allocation7 + $0x10] sm:$0xff]   ;;  %v1018_v38 = vld [vmem:[#allocation7 + $0x8] sm:$0xff]   ;;  %v1019_v39 = vld [vmem:[#allocation7] sm:$0xff]  }
  0x61   : > { %873 = vmatprep.subr.bf16.mxu0 %v1007_v3  ;;  %v810_v42 = vld [vmem:[%s1527_s2] ss:$0 sm:$0xff]  ;;  %p1110_p9 = pnand %p1109_p7, %p1103_p2 }
  0x63   : > { %904 = vmatpush3.bf16.msra.mxu1 %v1014_v11 }
  0x64   : > { %874 = vmatpush3.bf16.msra.mxu0 %v1007_v3  ;;  %905 = vmatprep.subr.bf16.mxu1 %v1015_v13 }
  0x65   : > { %875 = vmatprep.subr.bf16.mxu0 %v1008_v7 }
  0x67   : > { %906 = vmatpush3.bf16.msra.mxu1 %v1015_v13 }
  0x68   : > { %876 = vmatpush3.bf16.msra.mxu0 %v1008_v7  ;;  %907 = vmatprep.subr.bf16.mxu1 %v1016_v15 }
  0x69   : > { %877 = vmatprep.subr.bf16.mxu0 %v1009_v10 }
  0x6b   : > { %908 = vmatpush3.bf16.msra.mxu1 %v1016_v15 }
  0x6c   : > { %878 = vmatpush3.bf16.msra.mxu0 %v1009_v10  ;;  %909 = vmatprep.subr.bf16.mxu1 %v1017_v37 }
  0x6d   : > { %879 = vmatprep.subr.bf16.mxu0 %v1010_v12 }
  0x6f   : > { %910 = vmatpush3.bf16.msra.mxu1 %v1017_v37 }
  0x70   : > { %880 = vmatpush3.bf16.msra.mxu0 %v1010_v12  ;;  %911 = vmatprep.subr.bf16.mxu1 %v1018_v38 }
  0x71   : > { %881 = vmatprep.subr.bf16.mxu0 %v1011_v14 }
  0x73   : > { %912 = vmatpush3.bf16.msra.mxu1 %v1018_v38 }
  0x74   : > { %882 = vmatpush3.bf16.msra.mxu0 %v1011_v14  ;;  %913 = vmatprep.subr.bf16.mxu1 %v1019_v39 }
  0x77   : > { %884 = vmatmul.mubr.bf16.vlgmr.msra.gmra.mxu0 %v292_v20  ;;  %914 = vmatpush3.bf16.msra.mxu1 %v1019_v39 }
  0x78   : > { %887 = vmatprep.mubr.bf16.mxu0 %v293_v21 }
  0x7f   : > { %888 = vmatmul.mubr.bf16.gmra.mxu0 %v294_v26 }
  0x80   : > { %891 = vmatprep.mubr.bf16.mxu0 %v295_v27 }
  0x87   : > { %892 = vmatmul.mubr.bf16.gmra.mxu0 %v296_v32 }
  0x88   : > { %895 = vmatprep.mubr.bf16.mxu0 %v297_v33 }
  0x8f   : > { %896 = vmatmul.mubr.bf16.gmra.mxu0 %v298_v36 }
 0x137   : > { %v885_v40 = vpop.f32.mrf.mxu0 }
 0x138   : > { %v413_v46 = vadd.f32 %v885_v40, %v810_v42 }
 0x139   : > { %v404_v41 = vpop.f32.mrf.mxu0 }
 0x13a   : > { %v405_v44 = vadd.f32 %v810_v42, %v404_v41  ;;  %v469_v53 = vmax.f32 %v413_v46, 0.0 }
 0x13b   : > { %v886_v43 = vpop.f32.mrf.mxu0 }
 0x13c   : > { %v416_v45 = vadd.f32 %v886_v43, %v810_v42  ;;  %v467_v51 = vmax.f32 %v405_v44, 0.0 }
 0x13d   : > { %v407_v47 = vpop.f32.mrf.mxu0 }
 0x13e   : > { %v408_v48 = vadd.f32 %v810_v42, %v407_v47  ;;  %v470_v49 = vmax.f32 %v416_v45, 0.0 }
 0x13f   : > { %v889_v50 = vpop.f32.mrf.mxu0 }
 0x140   : > { %v468_v52 = vmax.f32 %v408_v48, 0.0  ;;  %v484_v56 = vpack.c.bf16 %v470_v49, %v469_v53  ;;  %v429_v60 = vadd.f32 %v889_v50, %v810_v42  ;;  %v1422_v50 = vld [vmem:[%s1529_s4] ss:$0 sm:$0xff] }
 0x141   : > { %v420_v54 = vpop.f32.mrf.mxu0 }
 0x142   : > { %v483_v55 = vpack.c.bf16 %v468_v52, %v467_v51  ;;  %v421_v58 = vadd.f32 %v810_v42, %v420_v54  ;;  %v473_v3 = vmax.f32 %v429_v60, 0.0 }
 0x143   : > { %v890_v57 = vpop.f32.mrf.mxu0 }
 0x144   : > { %v432_v59 = vadd.f32 %v890_v57, %v810_v42  ;;  %915 = vmatprep.mubr.bf16.mxu1 %v483_v55  ;;  %v471_v1 = vmax.f32 %v421_v58, 0.0 }
 0x145   : > { %v423_v61 = vpop.f32.mrf.mxu0  ;;  %916 = vmatmul.mubr.bf16.vlgmr.msra.gmra.mxu1 %v484_v56 }
 0x146   : > { %v424_v62 = vadd.f32 %v810_v42, %v423_v61  ;;  %v474_v63 = vmax.f32 %v432_v59, 0.0 }
 0x147   : > { %v893_v0 = vpop.f32.mrf.mxu0 }
 0x148   : > { %v472_v2 = vmax.f32 %v424_v62, 0.0  ;;  %v486_v8 = vpack.c.bf16 %v474_v63, %v473_v3  ;;  %v445_v12 = vadd.f32 %v893_v0, %v810_v42 }
 0x149   : > { %v436_v6 = vpop.f32.mrf.mxu0 }
 0x14a   : > { %v485_v7 = vpack.c.bf16 %v472_v2, %v471_v1  ;;  %v437_v10 = vadd.f32 %v810_v42, %v436_v6  ;;  %v477_v27 = vmax.f32 %v445_v12, 0.0 }
 0x14b   : > { %v894_v9 = vpop.f32.mrf.mxu0 }
 0x14c   : > { %v448_v11 = vadd.f32 %v894_v9, %v810_v42  ;;  %919 = vmatprep.mubr.bf16.mxu1 %v485_v7  ;;  %v475_v21 = vmax.f32 %v437_v10, 0.0 }
 0x14d   : > { %v439_v13 = vpop.f32.mrf.mxu0  ;;  %920 = vmatmul.mubr.bf16.gmra.mxu1 %v486_v8 }
 0x14e   : > { %v440_v14 = vadd.f32 %v810_v42, %v439_v13  ;;  %v478_v15 = vmax.f32 %v448_v11, 0.0 }
 0x14f   : > { %v897_v20 = vpop.f32.mrf.mxu0 }
 0x150   : > { %v476_v26 = vmax.f32 %v440_v14, 0.0  ;;  %v488_v36 = vpack.c.bf16 %v478_v15, %v477_v27  ;;  %v461_v40 = vadd.f32 %v897_v20, %v810_v42 }
 0x151   : > { %v452_v32 = vpop.f32.mrf.mxu0 }
 0x152   : > { %v487_v33 = vpack.c.bf16 %v476_v26, %v475_v21  ;;  %v453_v38 = vadd.f32 %v810_v42, %v452_v32  ;;  %v481_v47 = vmax.f32 %v461_v40, 0.0 }
 0x153   : > { %v898_v37 = vpop.f32.mrf.mxu0 }
 0x154   : > { %v464_v39 = vadd.f32 %v898_v37, %v810_v42  ;;  %923 = vmatprep.mubr.bf16.mxu1 %v487_v33  ;;  %v479_v45 = vmax.f32 %v453_v38, 0.0 }
 0x155   : > { %v455_v41 = vpop.f32.mrf.mxu0  ;;  %924 = vmatmul.mubr.bf16.gmra.mxu1 %v488_v36 }
 0x156   : > { %v456_v43 = vadd.f32 %v810_v42, %v455_v41  ;;  %v482_v44 = vmax.f32 %v464_v39, 0.0 }
 0x158   : > { %v480_v46 = vmax.f32 %v456_v43, 0.0  ;;  %v490_v49 = vpack.c.bf16 %v482_v44, %v481_v47 }
 0x15a   : > { %v489_v48 = vpack.c.bf16 %v480_v46, %v479_v45 }
 0x15c   : > { %927 = vmatprep.mubr.bf16.mxu1 %v489_v48 }
 0x15d   : > { %928 = vmatmul.mubr.bf16.gmra.mxu1 %v490_v49 }
 0x205   : > { %v917_v51 = vpop.f32.mrf.mxu1 }
 0x206   : > { %v605_v52 = vadd.f32 %v917_v51, %v1422_v50 }
 0x207   : > { %v596_v53 = vpop.f32.mrf.mxu1 }
 0x208   : > { %v661_v42 = vadd.f32 %v605_v52, %v1361_v16  ;;  %v597_v54 = vadd.f32 %v1422_v50, %v596_v53 }
 0x209   : > { %v918_v55 = vpop.f32.mrf.mxu1 }
 0x20a   : > { %677 = vst [vmem:[%s1429_s11 + $0x10] sm:$0xff] %v661_v42  ;;  %v659_v56 = vadd.f32 %v597_v54, %v1353_v4  ;;  %v608_v57 = vadd.f32 %v918_v55, %v1422_v50 }
 0x20b   : > { %v599_v58 = vpop.f32.mrf.mxu1 }
 0x20c   : > { %675 = vst [vmem:[%s1429_s11] sm:$0xff] %v659_v56  ;;  %v662_v16 = vadd.f32 %v608_v57, %v1364_v17  ;;  %v600_v59 = vadd.f32 %v1422_v50, %v599_v58 }
 0x20d   : > { %v921_v60 = vpop.f32.mrf.mxu1 }
 0x20e   : > { %678 = vst [vmem:[%s1429_s11 + $0x18] sm:$0xff] %v662_v16  ;;  %v660_v61 = vadd.f32 %v600_v59, %v1356_v5  ;;  %v621_v62 = vadd.f32 %v921_v60, %v1422_v50 }
 0x20f   : > { %v612_v63 = vpop.f32.mrf.mxu1 }
 0x210   : > { %676 = vst [vmem:[%s1429_s11 + $0x8] sm:$0xff] %v660_v61  ;;  %v665_v4 = vadd.f32 %v621_v62, %v1377_v22  ;;  %v613_v0 = vadd.f32 %v1422_v50, %v612_v63 }
 0x211   : > { %v922_v1 = vpop.f32.mrf.mxu1 }
 0x212   : > { %681 = vst [vmem:[%s1429_s11 + $0x30] sm:$0xff] %v665_v4  ;;  %v663_v17 = vadd.f32 %v613_v0, %v1367_v18  ;;  %v624_v2 = vadd.f32 %v922_v1, %v1422_v50 }
 0x213   : > { %v615_v3 = vpop.f32.mrf.mxu1 }
 0x214   : > { %679 = vst [vmem:[%s1429_s11 + $0x20] sm:$0xff] %v663_v17  ;;  %v666_v5 = vadd.f32 %v624_v2, %v1380_v23  ;;  %v616_v6 = vadd.f32 %v1422_v50, %v615_v3 }
 0x215   : > { %v925_v7 = vpop.f32.mrf.mxu1 }
 0x216   : > { %682 = vst [vmem:[%s1429_s11 + $0x38] sm:$0xff] %v666_v5  ;;  %v664_v22 = vadd.f32 %v616_v6, %v1370_v19  ;;  %v637_v8 = vadd.f32 %v925_v7, %v1422_v50 }
 0x217   : > { %v628_v9 = vpop.f32.mrf.mxu1 }
 0x218   : > { %680 = vst [vmem:[%s1429_s11 + $0x28] sm:$0xff] %v664_v22  ;;  %v669_v18 = vadd.f32 %v637_v8, %v1393_v28  ;;  %v629_v10 = vadd.f32 %v1422_v50, %v628_v9 }
 0x219   : > { %v926_v11 = vpop.f32.mrf.mxu1 }
 0x21a   : > { %685 = vst [vmem:[%s1429_s11 + $0x50] sm:$0xff] %v669_v18  ;;  %v667_v23 = vadd.f32 %v629_v10, %v1383_v24  ;;  %v640_v12 = vadd.f32 %v926_v11, %v1422_v50 }
 0x21b   : > { %v631_v13 = vpop.f32.mrf.mxu1 }
 0x21c   : > { %683 = vst [vmem:[%s1429_s11 + $0x40] sm:$0xff] %v667_v23  ;;  %v670_v19 = vadd.f32 %v640_v12, %v1396_v29  ;;  %v632_v14 = vadd.f32 %v1422_v50, %v631_v13 }
 0x21d   : > { %v929_v15 = vpop.f32.mrf.mxu1 }
 0x21e   : > { %686 = vst [vmem:[%s1429_s11 + $0x58] sm:$0xff] %v670_v19  ;;  %v668_v28 = vadd.f32 %v632_v14, %v1386_v25  ;;  %v653_v20 = vadd.f32 %v929_v15, %v1422_v50 }
 0x21f   : > { %v644_v21 = vpop.f32.mrf.mxu1 }
 0x220   : > { %684 = vst [vmem:[%s1429_s11 + $0x48] sm:$0xff] %v668_v28  ;;  %v673_v24 = vadd.f32 %v653_v20, %v1409_v34  ;;  %v645_v26 = vadd.f32 %v1422_v50, %v644_v21 }
 0x221   : > { %v930_v27 = vpop.f32.mrf.mxu1 }
 0x222   : > { %689 = vst [vmem:[%s1429_s11 + $0x70] sm:$0xff] %v673_v24  ;;  %v671_v29 = vadd.f32 %v645_v26, %v1399_v30  ;;  %v656_v32 = vadd.f32 %v930_v27, %v1422_v50 }
 0x223   : > { %v647_v25 = vpop.f32.mrf.mxu1 }
 0x224   : > { %687 = vst [vmem:[%s1429_s11 + $0x60] sm:$0xff] %v671_v29  ;;  %v674_v33 = vadd.f32 %v656_v32, %v1412_v35  ;;  %v648_v36 = vadd.f32 %v1422_v50, %v647_v25 }
 0x226   : > { %690 = vst [vmem:[%s1429_s11 + $0x78] sm:$0xff] %v674_v33  ;;  %v672_v30 = vadd.f32 %v648_v36, %v1402_v31 }
 0x228   : > { %688 = vst [vmem:[%s1429_s11 + $0x68] sm:$0xff] %v672_v30 }
 0x229   : > { %1113 = shalt.err (!%p1110_p9)
}
 0x22a   : > { %s1114_s30 = scalar_lea.hbm %s1478_s9, 2048  ;;  %s1118_s8 = scalar_lea.hbm %s1530_s5, 8192 }
 0x22b   : > { %p1115_p12 = scmp.ne.s32.totalorder %s1478_s9, %s1114_s30  ;;  %p1119_p4 = scmp.lt.s32.totalorder %s1478_s9, %s1530_s5 }
 0x22c   : > { %p1120_p8 = scmp.lt.s32.totalorder %s1118_s8, %s1114_s30 }
 0x22d   : > { %p1116_p3 = pnand %p1115_p12, %p1546_p0 }
 0x22e   : > { %p1121_p5 = por %p1120_p8, %p1119_p4 }
 0x22f   : > { %p1117_p13 = pneg %p1116_p3 }
 0x231   : > { %p1122_p10 = pnand %p1121_p5, %p1117_p13 }
 0x233   : > { %1125 = shalt.err (!%p1122_p10)
}
 0x234   : > { %s1178_s12 = smov 128   ;;  %s1179_s6 = smov 8  }
 0x235   : > { %941 = dma.vmem_to_hbm [thread:$0]  (%p1546_p0), %s1480_s28, 2048, %s1478_s9, %s692_s22, %s1178_s12, %s1178_s12, %s1179_s6  }
 0x236 PF: > { %p963_p1 = scmp.ge.s32.totalorder %s1168_s21, 2  ;;  %s720_s7 = sand.u32 1, %s1156_s18  }
 0x237   : > { %p1547_p2 = scmp.ne.s32.totalorder %s1536_s25, 0  ;;  %s721_s13 = scalar_lea.sflag [#allocation4], %s720_s7 }
 0x239   : > { %p955_p6 = pnand %p963_p1, %p1547_p2 }
 0x23b   : > { %p956_p11 = pneg %p955_p6 }
 0x23d   : > { %1151 = dma.done.wait (%p956_p11), %s721_s13, 2048  }
 0x23e   : > { %1153 = vsyncadd (%p956_p11), %s721_s13, 4294965248  ;;  %p19_p7 = scmp.ge.s32.totalorder %s1281_s15, 6   ;;  %s1548_s18 = smov %s1160_s19 }
 0x23f   : > { %s1549_s19 = smov %s1164_s20  ;;  %s1550_s20 = smov %s1297_s27 }
 0x240   : > { %s1551_s21 = smov %s1281_s15  ;;  %21 = sbr.rel (!%p19_p7) target bundleno = 6 (0x6), region = 93 }
 0x245   :  { %726 = vsyncpa [#allocation3], 1 }
 0x246   :  { %728 = vsyncpa [#allocation3 + $0x1], 1 }
 0x247   :  { %729 = vsyncpa [#allocation6], 1 }
 0x248   :  { %730 = vsyncpa [#allocation4], 1 }
 0x249   :  { %732 = vsyncpa [#allocation4 + $0x1], 1 }

// kernel: tpu_custom_call.1
= control target key start
LH: loop header
LB: loop body
LE: loop exit
PB: predicated region body
PF: predicated region fallthrough
CT: control target
= control target key end

     0   :  { %10 = vsyncpa [#allocation3], 0  ;;  %s1525_s0 = inlined_call_operand.hbm [shape: f32[512,128], index: 0, kind: input, shape index: {}]   ;;  %s1526_s1 = inlined_call_operand.hbm [shape: bf16[128,128], index: 1, kind: input, shape index: {}]   ;;  %s1527_s2 = inlined_call_operand.vmem [shape: f32[1,128], index: 2, kind: input, shape index: {}]   ;;  %s1528_s3 = inlined_call_operand.hbm [shape: bf16[128,128], index: 3, kind: input, shape index: {}]   ;;  %s1529_s4 = inlined_call_operand.vmem [shape: f32[1,128], index: 4, kind: input, shape index: {}]   ;;  %s1530_s5 = inlined_call_operand.hbm [shape: f32[512,128], index: 5, kind: output, shape index: {}]  }
   0x1   :  { %12 = vsyncpa [#allocation3 + $0x1], 0 }
   0x2   :  { %13 = vsyncpa [#allocation6], 0 }
   0x3   :  { %14 = vsyncpa [#allocation4], 0 }
   0x4   :  { %16 = vsyncpa [#allocation4 + $0x1], 0  ;;  %s1210_s18 = smov 0   ;;  %s1212_s19 = smov 0  }
   0x5   :  { %s1214_s20 = smov 0   ;;  %s1216_s21 = smov 0  }
   0x6 LB: > { %s1231_s22 = sadd.s32 4294967295, %s1168_s21   ;;  %s797_s23 = sadd.s32 4294967294, %s1168_s21   ;;  %s1168_s21 = sphi %s1216_s21, %s1551_s21   ;;  %s1164_s20 = sphi %s1214_s20, %s1550_s20   ;;  %s1160_s19 = sphi %s1212_s19, %s1549_s19   ;;  %s1156_s18 = sphi %s1210_s18, %s1548_s18  }
   0x7   : > { %p42_p0 = scmp.ne.s32.totalorder %s1160_s19, %s1156_s18  ;;  %p1531_p1 = scmp.eq.s32.totalorder %s1231_s22, 0 }
   0x8   : > { %p156_p3 = scmp.eq.s32.totalorder %s797_s23, 3  ;;  %p798_p5 = scmp.ge.s32.totalorder %s1168_s21, 1 }
   0x9   : > { %p1240_p4 = por %p1531_p1, %p42_p0  ;;  %p163_p7 = scmp.lt.s32.totalorder %s1168_s21, 5 }
   0xa   : > { %p1245_p6 = por %p156_p3, %p42_p0  ;;  %s1170_s27 = smov [#allocation5]  }
   0xb   : > { %s1535_s24 = scalar_select %p1240_p4, 1, 0 }
   0xc   : > { %s1536_s25 = scalar_select %p1245_p6, 1, 0 }
   0xd   : > { %p1250_p8 = pnand %p798_p5, %p163_p7  ;;  %s175_s28 = sshll.u32 %s1170_s27, 4  ;;  %s176_s28 = int_to_ptr.vmem [resolvable:$true] %s175_s28 }
   0xe   : > { %s1171_s30 = smov [#allocation7]   ;;  %s1031_s7 = scalar_lea.vmem %s176_s28, 1024 }
   0xf   : > { %s1537_s26 = scalar_select %p1250_p8, 1, 0 }
  0x10   : > { %p943_p9 = pneg %p1250_p8  ;;  %s191_s6 = sshll.u32 %s1171_s30, 4  ;;  %s192_s6 = int_to_ptr.vmem [resolvable:$true] %s191_s6 }
  0x11   : > { %p1032_p12 = scmp.ne.s32.totalorder %s176_s28, %s1031_s7  ;;  %p1039_p3 = scmp.lt.s32.totalorder %s176_s28, %s176_s28 }
  0x12   : > { %p1258_p10 = pnand %p943_p9, %p1531_p1  ;;  %p1040_p5 = scmp.lt.s32.totalorder %s1031_s7, %s1031_s7 }
  0x14   : > { %p1022_p11 = pneg %p1258_p10  ;;  %p1041_p7 = por %p1040_p5, %p1039_p3 }
  0x16   : > { %p1034_p13 = pnand %p1032_p12, %p1022_p11 }
  0x18   : > { %p1035_p0 = pneg %p1034_p13 }
  0x1a   : > { %p1042_p9 = pnand %p1041_p7, %p1035_p0 }
  0x1c   : > { %1045 = shalt.err (!%p1042_p9)
}
  0x1d   : > { %s1172_s8 = smov 64   ;;  %s1173_s9 = smov 4  }
  0x1e   : > { %946 = dma.hbm_to_vmem [thread:$0]  (!%p1258_p10), %s1526_s1, 1024, %s176_s28, [#allocation6], %s1172_s8, %s1172_s8, %s1173_s9  }
  0x1f   : > { %s1057_s12 = scalar_lea.vmem %s192_s6, 1024  ;;  %p1065_p2 = scmp.lt.s32.totalorder %s192_s6, %s192_s6 }
  0x20   : > { %p1058_p1 = scmp.ne.s32.totalorder %s192_s6, %s1057_s12  ;;  %p1066_p6 = scmp.lt.s32.totalorder %s1057_s12, %s1057_s12 }
  0x22   : > { %p1060_p12 = pnand %p1058_p1, %p1022_p11  ;;  %p1067_p3 = por %p1066_p6, %p1065_p2 }
  0x24   : > { %p1061_p13 = pneg %p1060_p12 }
  0x26   : > { %p1068_p0 = pnand %p1067_p3, %p1061_p13 }
  0x28   : > { %1071 = shalt.err (!%p1068_p0)
}
  0x29   : > { %949 = dma.hbm_to_vmem [thread:$0]  (!%p1258_p10), %s1528_s3, 1024, %s192_s6, [#allocation6], %s1172_s8, %s1172_s8, %s1173_s9  }
  0x2a   : > { %s1281_s15 = sadd.s32 1, %s1168_s21   ;;  %s29_s16 = sadd.s32 1, %s1164_s20 }
  0x2b   : > { %s26_s17 = ssub.s32 %s1168_s21, %s1281_s15  ;;  %p36_p1 = scmp.ne.s32.totalorder %s1164_s20, %s1160_s19 }
  0x2c   : > { %p27_p2 = scmp.eq.s32.totalorder %s26_s17, 0  ;;  %p37_p6 = scmp.eq.s32.totalorder %s1168_s21, 0 }
  0x2d   : > { %p1539_p11 = scmp.eq.s32.totalorder %s1231_s22, 3  ;;  %p960_p7 = scmp.lt.s32.totalorder %s1168_s21, 4 }
  0x2e   : > { %s1297_s27 = scalar_select %p27_p2, %s1164_s20, %s29_s16  }
  0x2f   : > { %p1291_p5 = por %p1539_p11, %p36_p1  ;;  %p38_p9 = por %p37_p6, %p36_p1 }
  0x30   : > { %s208_s28 = sand.u32 1, %s1164_s20   ;;  %s833_s30 = sshll.u32 %s1168_s21, 11 }
  0x31   : > { %s1540_s23 = scalar_select %p1291_p5, 1, 0 }
  0x32   : > { %s802_s29 = sshll.u32 %s208_s28, 7  ;;  %s1304_s8 = scalar_lea.hbm %s1525_s0, %s833_s30 }
  0x33   : > { %s212_s9 = scalar_lea.vmem [#allocation2], %s802_s29  ;;  %p1308_p10 = pnand %p960_p7, %p38_p9 }
  0x34   : > { %s219_s10 = sshll.u32 %s212_s9, 4  ;;  %s1312_s12 = scalar_lea.sflag [#allocation3], %s208_s28  ;;  %s1306_s10 = int_to_ptr.vmem [resolvable:$true] %s219_s10 }
  0x35   : > { %s1072_s13 = scalar_lea.hbm %s1304_s8, 2048  ;;  %p1074_p13 = pneg %p1308_p10 }
  0x36   : > { %p1073_p12 = scmp.ne.s32.totalorder %s1304_s8, %s1072_s13  ;;  %s1077_s17 = scalar_lea.hbm %s1525_s0, 8192 }
  0x37   : > { %p1078_p1 = scmp.lt.s32.totalorder %s1304_s8, %s1525_s0  ;;  %p1079_p2 = scmp.lt.s32.totalorder %s1077_s17, %s1072_s13 }
  0x38   : > { %p1075_p3 = pnand %p1074_p13, %p1073_p12 }
  0x39   : > { %p1080_p6 = por %p1079_p2, %p1078_p1 }
  0x3a   : > { %p1076_p0 = pneg %p1075_p3 }
  0x3c   : > { %p1081_p11 = pnand %p1080_p6, %p1076_p0 }
  0x3e   : > { %1084 = shalt.err (!%p1081_p11)
}
  0x3f   : > { %s1085_s28 = scalar_lea.vmem %s1306_s10, 2048  ;;  %s1174_s6 = smov [#allocation2]  }
  0x40   : > { %p1086_p7 = scmp.ne.s32.totalorder %s1306_s10, %s1085_s28  ;;  %s1090_s7 = sshll.u32 %s1174_s6, 4  ;;  %s1091_s7 = int_to_ptr.vmem [resolvable:$false] %s1090_s7 }
  0x41   : > { %s1092_s9 = scalar_lea.vmem %s1091_s7, 4096  ;;  %p1093_p3 = scmp.lt.s32.totalorder %s1306_s10, %s1091_s7 }
  0x42   : > { %p1088_p9 = pnand %p1086_p7, %p1074_p13  ;;  %p1094_p5 = scmp.lt.s32.totalorder %s1092_s9, %s1085_s28 }
  0x44   : > { %p1089_p12 = pneg %p1088_p9  ;;  %p1095_p4 = por %p1094_p5, %p1093_p3 }
  0x46   : > { %p1096_p8 = pnand %p1095_p4, %p1089_p12 }
  0x48   : > { %1099 = shalt.err (!%p1096_p8)
}
  0x49   : > { %s1175_s13 = smov 128   ;;  %s1176_s14 = smov 8  }
  0x4a   : > { %953 = dma.hbm_to_vmem [thread:$0]  (!%p1308_p10), %s1304_s8, 2048, %s1306_s10, %s1312_s12, %s1175_s13, %s1175_s13, %s1176_s14  }
  0x4b   : > { %p1542_p13 = scmp.ne.s32.totalorder %s1537_s26, 0 }
  0x4c   : > { %s1336_s16 = sand.u32 (!%p1542_p13), 1, %s1160_s19   ;;  %p1543_p4 = scmp.ne.s32.totalorder (!%p1542_p13), %s1535_s24, 0 }
  0x4d   : > { %231 = sbr.rel (%p1542_p13) target bundleno = 566 (0x236), region = 40  ;;  %s806_s17 = sshll.u32 (!%p1542_p13), %s1336_s16, 7 }
  0x4e   : > { %s234_s29 = scalar_lea.sflag (!%p1542_p13), [#allocation3], %s1336_s16  ;;  %s1342_s30 = scalar_lea.vmem (!%p1542_p13), [#allocation2], %s806_s17 }
  0x52   : > { %1143 = dma.done.wait (%p1543_p4), %s234_s29, 2048  }
  0x53   : > { %1145 = vsyncadd (%p1543_p4), %s234_s29, 4294965248  ;;  %p1544_p8 = scmp.eq.s32.totalorder %s1231_s22, 0 }
  0x55   : > { %1147 = dma.done.wait (%p1544_p8), [#allocation6], 2048   ;;  %p1545_p5 = pmov %p1544_p8 }
  0x56   : > { %v1004_v0 = vld [vmem:[#allocation5 + $0x38] sm:$0xff]   ;;  %v1005_v1 = vld [vmem:[#allocation5 + $0x30] sm:$0xff]   ;;  %v1006_v2 = vld [vmem:[#allocation5 + $0x28] sm:$0xff]   ;;  %s1429_s11 = scalar_lea.vmem [#allocation8], %s806_s17  ;;  %s834_s12 = sshll.u32 %s1231_s22, 11 }
  0x57   : > { %1149 = vsyncadd (%p1545_p5), [#allocation6], 4294965248  ;;  %867 = vmatprep.subr.bf16.mxu0 %v1004_v0  ;;  %v1007_v3 = vld [vmem:[#allocation5 + $0x20] sm:$0xff]   ;;  %v1356_v5 = vld [vmem:[%s1342_s30 + $0x8] sm:$0xff]  ;;  %s705_s28 = sshll.u32 %s1429_s11, 4  ;;  %s1478_s9 = scalar_lea.hbm %s1530_s5, %s834_s12  ;;  %s1480_s28 = int_to_ptr.vmem [resolvable:$true] %s705_s28 }
  0x58   : > { %868 = vmatpush3.bf16.msra.mxu0 %v1004_v0  ;;  %v1353_v4 = vld [vmem:[%s1342_s30] sm:$0xff]  ;;  %v1008_v7 = vld [vmem:[#allocation5 + $0x18] sm:$0xff]   ;;  %v1013_v9 = vld [vmem:[#allocation7 + $0x30] sm:$0xff]   ;;  %s692_s22 = scalar_lea.sflag [#allocation4], %s1336_s16  ;;  %s1100_s13 = scalar_lea.vmem %s1480_s28, 2048 }
  0x59   : > { %869 = vmatprep.subr.bf16.mxu0 %v1005_v1  ;;  %v291_v6 = vpack.c.bf16 %v1356_v5, %v1353_v4  ;;  %v1012_v8 = vld [vmem:[#allocation7 + $0x38] sm:$0xff]   ;;  %v1009_v10 = vld [vmem:[#allocation5 + $0x10] sm:$0xff]   ;;  %v1014_v11 = vld [vmem:[#allocation7 + $0x28] sm:$0xff]   ;;  %p1101_p10 = scmp.ne.s32.totalorder %s1480_s28, %s1100_s13  ;;  %p1546_p0 = scmp.ne.s32.totalorder %s1540_s23, 0 }
  0x5a   : > { %899 = vmatprep.subr.bf16.mxu1 %v1012_v8  ;;  %v1010_v12 = vld [vmem:[#allocation5 + $0x8] sm:$0xff]   ;;  %v1015_v13 = vld [vmem:[#allocation7 + $0x20] sm:$0xff]   ;;  %v1016_v15 = vld [vmem:[#allocation7 + $0x18] sm:$0xff]   ;;  %s1177_s14 = smov [#allocation8]  }
  0x5b   : > { %883 = vmatprep.mubr.bf16.mxu0 %v291_v6  ;;  %900 = vmatpush3.bf16.msra.mxu1 %v1012_v8  ;;  %v1011_v14 = vld [vmem:[#allocation5] sm:$0xff]   ;;  %v1361_v16 = vld [vmem:[%s1342_s30 + $0x10] sm:$0xff]  ;;  %v1364_v17 = vld [vmem:[%s1342_s30 + $0x18] sm:$0xff]  ;;  %p1102_p1 = pnand %p1101_p10, %p1546_p0  ;;  %s1104_s17 = sshll.u32 %s1177_s14, 4  ;;  %s1105_s17 = int_to_ptr.vmem [resolvable:$false] %s1104_s17 }
  0x5c   : > { %870 = vmatpush3.bf16.msra.mxu0 %v1005_v1  ;;  %901 = vmatprep.subr.bf16.mxu1 %v1013_v9  ;;  %v1367_v18 = vld [vmem:[%s1342_s30 + $0x20] sm:$0xff]  ;;  %v1370_v19 = vld [vmem:[%s1342_s30 + $0x28] sm:$0xff]  ;;  %v292_v20 = vpack.c.bf16 %v1364_v17, %v1361_v16  ;;  %v1377_v22 = vld [vmem:[%s1342_s30 + $0x30] sm:$0xff]  ;;  %s1106_s29 = scalar_lea.vmem %s1105_s17, 4096  ;;  %p1107_p6 = scmp.lt.s32.totalorder %s1480_s28, %s1105_s17 }
  0x5d   : > { %871 = vmatprep.subr.bf16.mxu0 %v1006_v2  ;;  %v293_v21 = vpack.c.bf16 %v1370_v19, %v1367_v18  ;;  %v1380_v23 = vld [vmem:[%s1342_s30 + $0x38] sm:$0xff]  ;;  %v1383_v24 = vld [vmem:[%s1342_s30 + $0x40] sm:$0xff]  ;;  %v1386_v25 = vld [vmem:[%s1342_s30 + $0x48] sm:$0xff]  ;;  %p1103_p2 = pneg %p1102_p1  ;;  %p1108_p11 = scmp.lt.s32.totalorder %s1106_s29, %s1100_s13 }
  0x5e   : > { %v294_v26 = vpack.c.bf16 %v1380_v23, %v1377_v22  ;;  %v295_v27 = vpack.c.bf16 %v1386_v25, %v1383_v24  ;;  %v1393_v28 = vld [vmem:[%s1342_s30 + $0x50] sm:$0xff]  ;;  %v1396_v29 = vld [vmem:[%s1342_s30 + $0x58] sm:$0xff]  ;;  %v1399_v30 = vld [vmem:[%s1342_s30 + $0x60] sm:$0xff] }
  0x5f   : > { %902 = vmatpush3.bf16.msra.mxu1 %v1013_v9  ;;  %v1402_v31 = vld [vmem:[%s1342_s30 + $0x68] sm:$0xff]  ;;  %v296_v32 = vpack.c.bf16 %v1396_v29, %v1393_v28  ;;  %v1409_v34 = vld [vmem:[%s1342_s30 + $0x70] sm:$0xff]  ;;  %v1412_v35 = vld [vmem:[%s1342_s30 + $0x78] sm:$0xff]  ;;  %p1109_p7 = por %p1108_p11, %p1107_p6 }
  0x60   : > { %872 = vmatpush3.bf16.msra.mxu0 %v1006_v2  ;;  %903 = vmatprep.subr.bf16.mxu1 %v1014_v11  ;;  %v297_v33 = vpack.c.bf16 %v1402_v31, %v1399_v30  ;;  %v298_v36 = vpack.c.bf16 %v1412_v35, %v1409_v34  ;;  %v1017_v37 = vld [vmem:[#allocation7 + $0x10] sm:$0xff]   ;;  %v1018_v38 = vld [vmem:[#allocation7 + $0x8] sm:$0xff]   ;;  %v1019_v39 = vld [vmem:[#allocation7] sm:$0xff]  }
  0x61   : > { %873 = vmatprep.subr.bf16.mxu0 %v1007_v3  ;;  %v810_v42 = vld [vmem:[%s1527_s2] ss:$0 sm:$0xff]  ;;  %p1110_p9 = pnand %p1109_p7, %p1103_p2 }
  0x63   : > { %904 = vmatpush3.bf16.msra.mxu1 %v1014_v11 }
  0x64   : > { %874 = vmatpush3.bf16.msra.mxu0 %v1007_v3  ;;  %905 = vmatprep.subr.bf16.mxu1 %v1015_v13 }
  0x65   : > { %875 = vmatprep.subr.bf16.mxu0 %v1008_v7 }
  0x67   : > { %906 = vmatpush3.bf16.msra.mxu1 %v1015_v13 }
  0x68   : > { %876 = vmatpush3.bf16.msra.mxu0 %v1008_v7  ;;  %907 = vmatprep.subr.bf16.mxu1 %v1016_v15 }
  0x69   : > { %877 = vmatprep.subr.bf16.mxu0 %v1009_v10 }
  0x6b   : > { %908 = vmatpush3.bf16.msra.mxu1 %v1016_v15 }
  0x6c   : > { %878 = vmatpush3.bf16.msra.mxu0 %v1009_v10  ;;  %909 = vmatprep.subr.bf16.mxu1 %v1017_v37 }
  0x6d   : > { %879 = vmatprep.subr.bf16.mxu0 %v1010_v12 }
  0x6f   : > { %910 = vmatpush3.bf16.msra.mxu1 %v1017_v37 }
  0x70   : > { %880 = vmatpush3.bf16.msra.mxu0 %v1010_v12  ;;  %911 = vmatprep.subr.bf16.mxu1 %v1018_v38 }
  0x71   : > { %881 = vmatprep.subr.bf16.mxu0 %v1011_v14 }
  0x73   : > { %912 = vmatpush3.bf16.msra.mxu1 %v1018_v38 }
  0x74   : > { %882 = vmatpush3.bf16.msra.mxu0 %v1011_v14  ;;  %913 = vmatprep.subr.bf16.mxu1 %v1019_v39 }
  0x77   : > { %884 = vmatmul.mubr.bf16.vlgmr.msra.gmra.mxu0 %v292_v20  ;;  %914 = vmatpush3.bf16.msra.mxu1 %v1019_v39 }
  0x78   : > { %887 = vmatprep.mubr.bf16.mxu0 %v293_v21 }
  0x7f   : > { %888 = vmatmul.mubr.bf16.gmra.mxu0 %v294_v26 }
  0x80   : > { %891 = vmatprep.mubr.bf16.mxu0 %v295_v27 }
  0x87   : > { %892 = vmatmul.mubr.bf16.gmra.mxu0 %v296_v32 }
  0x88   : > { %895 = vmatprep.mubr.bf16.mxu0 %v297_v33 }
  0x8f   : > { %896 = vmatmul.mubr.bf16.gmra.mxu0 %v298_v36 }
 0x137   : > { %v885_v40 = vpop.f32.mrf.mxu0 }
 0x138   : > { %v413_v46 = vadd.f32 %v885_v40, %v810_v42 }
 0x139   : > { %v404_v41 = vpop.f32.mrf.mxu0 }
 0x13a   : > { %v405_v44 = vadd.f32 %v810_v42, %v404_v41  ;;  %v469_v53 = vmax.f32 %v413_v46, 0.0 }
 0x13b   : > { %v886_v43 = vpop.f32.mrf.mxu0 }
 0x13c   : > { %v416_v45 = vadd.f32 %v886_v43, %v810_v42  ;;  %v467_v51 = vmax.f32 %v405_v44, 0.0 }
 0x13d   : > { %v407_v47 = vpop.f32.mrf.mxu0 }
 0x13e   : > { %v408_v48 = vadd.f32 %v810_v42, %v407_v47  ;;  %v470_v49 = vmax.f32 %v416_v45, 0.0 }
 0x13f   : > { %v889_v50 = vpop.f32.mrf.mxu0 }
 0x140   : > { %v468_v52 = vmax.f32 %v408_v48, 0.0  ;;  %v484_v56 = vpack.c.bf16 %v470_v49, %v469_v53  ;;  %v429_v60 = vadd.f32 %v889_v50, %v810_v42  ;;  %v1422_v50 = vld [vmem:[%s1529_s4] ss:$0 sm:$0xff] }
 0x141   : > { %v420_v54 = vpop.f32.mrf.mxu0 }
 0x142   : > { %v483_v55 = vpack.c.bf16 %v468_v52, %v467_v51  ;;  %v421_v58 = vadd.f32 %v810_v42, %v420_v54  ;;  %v473_v3 = vmax.f32 %v429_v60, 0.0 }
 0x143   : > { %v890_v57 = vpop.f32.mrf.mxu0 }
 0x144   : > { %v432_v59 = vadd.f32 %v890_v57, %v810_v42  ;;  %915 = vmatprep.mubr.bf16.mxu1 %v483_v55  ;;  %v471_v1 = vmax.f32 %v421_v58, 0.0 }
 0x145   : > { %v423_v61 = vpop.f32.mrf.mxu0  ;;  %916 = vmatmul.mubr.bf16.vlgmr.msra.gmra.mxu1 %v484_v56 }
 0x146   : > { %v424_v62 = vadd.f32 %v810_v42, %v423_v61  ;;  %v474_v63 = vmax.f32 %v432_v59, 0.0 }
 0x147   : > { %v893_v0 = vpop.f32.mrf.mxu0 }
 0x148   : > { %v472_v2 = vmax.f32 %v424_v62, 0.0  ;;  %v486_v8 = vpack.c.bf16 %v474_v63, %v473_v3  ;;  %v445_v12 = vadd.f32 %v893_v0, %v810_v42 }
 0x149   : > { %v436_v6 = vpop.f32.mrf.mxu0 }
 0x14a   : > { %v485_v7 = vpack.c.bf16 %v472_v2, %v471_v1  ;;  %v437_v10 = vadd.f32 %v810_v42, %v436_v6  ;;  %v477_v27 = vmax.f32 %v445_v12, 0.0 }
 0x14b   : > { %v894_v9 = vpop.f32.mrf.mxu0 }
 0x14c   : > { %v448_v11 = vadd.f32 %v894_v9, %v810_v42  ;;  %919 = vmatprep.mubr.bf16.mxu1 %v485_v7  ;;  %v475_v21 = vmax.f32 %v437_v10, 0.0 }
 0x14d   : > { %v439_v13 = vpop.f32.mrf.mxu0  ;;  %920 = vmatmul.mubr.bf16.gmra.mxu1 %v486_v8 }
 0x14e   : > { %v440_v14 = vadd.f32 %v810_v42, %v439_v13  ;;  %v478_v15 = vmax.f32 %v448_v11, 0.0 }
 0x14f   : > { %v897_v20 = vpop.f32.mrf.mxu0 }
 0x150   : > { %v476_v26 = vmax.f32 %v440_v14, 0.0  ;;  %v488_v36 = vpack.c.bf16 %v478_v15, %v477_v27  ;;  %v461_v40 = vadd.f32 %v897_v20, %v810_v42 }
 0x151   : > { %v452_v32 = vpop.f32.mrf.mxu0 }
 0x152   : > { %v487_v33 = vpack.c.bf16 %v476_v26, %v475_v21  ;;  %v453_v38 = vadd.f32 %v810_v42, %v452_v32  ;;  %v481_v47 = vmax.f32 %v461_v40, 0.0 }
 0x153   : > { %v898_v37 = vpop.f32.mrf.mxu0 }
 0x154   : > { %v464_v39 = vadd.f32 %v898_v37, %v810_v42  ;;  %923 = vmatprep.mubr.bf16.mxu1 %v487_v33  ;;  %v479_v45 = vmax.f32 %v453_v38, 0.0 }
 0x155   : > { %v455_v41 = vpop.f32.mrf.mxu0  ;;  %924 = vmatmul.mubr.bf16.gmra.mxu1 %v488_v36 }
 0x156   : > { %v456_v43 = vadd.f32 %v810_v42, %v455_v41  ;;  %v482_v44 = vmax.f32 %v464_v39, 0.0 }
 0x158   : > { %v480_v46 = vmax.f32 %v456_v43, 0.0  ;;  %v490_v49 = vpack.c.bf16 %v482_v44, %v481_v47 }
 0x15a   : > { %v489_v48 = vpack.c.bf16 %v480_v46, %v479_v45 }
 0x15c   : > { %927 = vmatprep.mubr.bf16.mxu1 %v489_v48 }
 0x15d   : > { %928 = vmatmul.mubr.bf16.gmra.mxu1 %v490_v49 }
 0x205   : > { %v917_v51 = vpop.f32.mrf.mxu1 }
 0x206   : > { %v605_v52 = vadd.f32 %v917_v51, %v1422_v50 }
 0x207   : > { %v596_v53 = vpop.f32.mrf.mxu1 }
 0x208   : > { %v661_v42 = vadd.f32 %v605_v52, %v1361_v16  ;;  %v597_v54 = vadd.f32 %v1422_v50, %v596_v53 }
 0x209   : > { %v918_v55 = vpop.f32.mrf.mxu1 }
 0x20a   : > { %677 = vst [vmem:[%s1429_s11 + $0x10] sm:$0xff] %v661_v42  ;;  %v659_v56 = vadd.f32 %v597_v54, %v1353_v4  ;;  %v608_v57 = vadd.f32 %v918_v55, %v1422_v50 }
 0x20b   : > { %v599_v58 = vpop.f32.mrf.mxu1 }
 0x20c   : > { %675 = vst [vmem:[%s1429_s11] sm:$0xff] %v659_v56  ;;  %v662_v16 = vadd.f32 %v608_v57, %v1364_v17  ;;  %v600_v59 = vadd.f32 %v1422_v50, %v599_v58 }
 0x20d   : > { %v921_v60 = vpop.f32.mrf.mxu1 }
 0x20e   : > { %678 = vst [vmem:[%s1429_s11 + $0x18] sm:$0xff] %v662_v16  ;;  %v660_v61 = vadd.f32 %v600_v59, %v1356_v5  ;;  %v621_v62 = vadd.f32 %v921_v60, %v1422_v50 }
 0x20f   : > { %v612_v63 = vpop.f32.mrf.mxu1 }
 0x210   : > { %676 = vst [vmem:[%s1429_s11 + $0x8] sm:$0xff] %v660_v61  ;;  %v665_v4 = vadd.f32 %v621_v62, %v1377_v22  ;;  %v613_v0 = vadd.f32 %v1422_v50, %v612_v63 }
 0x211   : > { %v922_v1 = vpop.f32.mrf.mxu1 }
 0x212   : > { %681 = vst [vmem:[%s1429_s11 + $0x30] sm:$0xff] %v665_v4  ;;  %v663_v17 = vadd.f32 %v613_v0, %v1367_v18  ;;  %v624_v2 = vadd.f32 %v922_v1, %v1422_v50 }
 0x213   : > { %v615_v3 = vpop.f32.mrf.mxu1 }
 0x214   : > { %679 = vst [vmem:[%s1429_s11 + $0x20] sm:$0xff] %v663_v17  ;;  %v666_v5 = vadd.f32 %v624_v2, %v1380_v23  ;;  %v616_v6 = vadd.f32 %v1422_v50, %v615_v3 }
 0x215   : > { %v925_v7 = vpop.f32.mrf.mxu1 }
 0x216   : > { %682 = vst [vmem:[%s1429_s11 + $0x38] sm:$0xff] %v666_v5  ;;  %v664_v22 = vadd.f32 %v616_v6, %v1370_v19  ;;  %v637_v8 = vadd.f32 %v925_v7, %v1422_v50 }
 0x217   : > { %v628_v9 = vpop.f32.mrf.mxu1 }
 0x218   : > { %680 = vst [vmem:[%s1429_s11 + $0x28] sm:$0xff] %v664_v22  ;;  %v669_v18 = vadd.f32 %v637_v8, %v1393_v28  ;;  %v629_v10 = vadd.f32 %v1422_v50, %v628_v9 }
 0x219   : > { %v926_v11 = vpop.f32.mrf.mxu1 }
 0x21a   : > { %685 = vst [vmem:[%s1429_s11 + $0x50] sm:$0xff] %v669_v18  ;;  %v667_v23 = vadd.f32 %v629_v10, %v1383_v24  ;;  %v640_v12 = vadd.f32 %v926_v11, %v1422_v50 }
 0x21b   : > { %v631_v13 = vpop.f32.mrf.mxu1 }
 0x21c   : > { %683 = vst [vmem:[%s1429_s11 + $0x40] sm:$0xff] %v667_v23  ;;  %v670_v19 = vadd.f32 %v640_v12, %v1396_v29  ;;  %v632_v14 = vadd.f32 %v1422_v50, %v631_v13 }
 0x21d   : > { %v929_v15 = vpop.f32.mrf.mxu1 }
 0x21e   : > { %686 = vst [vmem:[%s1429_s11 + $0x58] sm:$0xff] %v670_v19  ;;  %v668_v28 = vadd.f32 %v632_v14, %v1386_v25  ;;  %v653_v20 = vadd.f32 %v929_v15, %v1422_v50 }
 0x21f   : > { %v644_v21 = vpop.f32.mrf.mxu1 }
 0x220   : > { %684 = vst [vmem:[%s1429_s11 + $0x48] sm:$0xff] %v668_v28  ;;  %v673_v24 = vadd.f32 %v653_v20, %v1409_v34  ;;  %v645_v26 = vadd.f32 %v1422_v50, %v644_v21 }
 0x221   : > { %v930_v27 = vpop.f32.mrf.mxu1 }
 0x222   : > { %689 = vst [vmem:[%s1429_s11 + $0x70] sm:$0xff] %v673_v24  ;;  %v671_v29 = vadd.f32 %v645_v26, %v1399_v30  ;;  %v656_v32 = vadd.f32 %v930_v27, %v1422_v50 }
 0x223   : > { %v647_v25 = vpop.f32.mrf.mxu1 }
 0x224   : > { %687 = vst [vmem:[%s1429_s11 + $0x60] sm:$0xff] %v671_v29  ;;  %v674_v33 = vadd.f32 %v656_v32, %v1412_v35  ;;  %v648_v36 = vadd.f32 %v1422_v50, %v647_v25 }
 0x226   : > { %690 = vst [vmem:[%s1429_s11 + $0x78] sm:$0xff] %v674_v33  ;;  %v672_v30 = vadd.f32 %v648_v36, %v1402_v31 }
 0x228   : > { %688 = vst [vmem:[%s1429_s11 + $0x68] sm:$0xff] %v672_v30 }
 0x229   : > { %1113 = shalt.err (!%p1110_p9)
}
 0x22a   : > { %s1114_s30 = scalar_lea.hbm %s1478_s9, 2048  ;;  %s1118_s8 = scalar_lea.hbm %s1530_s5, 8192 }
 0x22b   : > { %p1115_p12 = scmp.ne.s32.totalorder %s1478_s9, %s1114_s30  ;;  %p1119_p4 = scmp.lt.s32.totalorder %s1478_s9, %s1530_s5 }
 0x22c   : > { %p1120_p8 = scmp.lt.s32.totalorder %s1118_s8, %s1114_s30 }
 0x22d   : > { %p1116_p3 = pnand %p1115_p12, %p1546_p0 }
 0x22e   : > { %p1121_p5 = por %p1120_p8, %p1119_p4 }
 0x22f   : > { %p1117_p13 = pneg %p1116_p3 }
 0x231   : > { %p1122_p10 = pnand %p1121_p5, %p1117_p13 }
 0x233   : > { %1125 = shalt.err (!%p1122_p10)
}
 0x234   : > { %s1178_s12 = smov 128   ;;  %s1179_s6 = smov 8  }
 0x235   : > { %941 = dma.vmem_to_hbm [thread:$0]  (%p1546_p0), %s1480_s28, 2048, %s1478_s9, %s692_s22, %s1178_s12, %s1178_s12, %s1179_s6  }
 0x236 PF: > { %p963_p1 = scmp.ge.s32.totalorder %s1168_s21, 2  ;;  %s720_s7 = sand.u32 1, %s1156_s18  }
 0x237   : > { %p1547_p2 = scmp.ne.s32.totalorder %s1536_s25, 0  ;;  %s721_s13 = scalar_lea.sflag [#allocation4], %s720_s7 }
 0x239   : > { %p955_p6 = pnand %p963_p1, %p1547_p2 }
 0x23b   : > { %p956_p11 = pneg %p955_p6 }
 0x23d   : > { %1151 = dma.done.wait (%p956_p11), %s721_s13, 2048  }
 0x23e   : > { %1153 = vsyncadd (%p956_p11), %s721_s13, 4294965248  ;;  %p19_p7 = scmp.ge.s32.totalorder %s1281_s15, 6   ;;  %s1548_s18 = smov %s1160_s19 }
 0x23f   : > { %s1549_s19 = smov %s1164_s20  ;;  %s1550_s20 = smov %s1297_s27 }
 0x240   : > { %s1551_s21 = smov %s1281_s15  ;;  %21 = sbr.rel (!%p19_p7) target bundleno = 6 (0x6), region = 93 }
 0x245   :  { %726 = vsyncpa [#allocation3], 1 }
 0x246   :  { %728 = vsyncpa [#allocation3 + $0x1], 1 }
 0x247   :  { %729 = vsyncpa [#allocation6], 1 }
 0x248   :  { %730 = vsyncpa [#allocation4], 1 }
 0x249   :  { %732 = vsyncpa [#allocation4 + $0x1], 1 }

</bundles_post_ra>
